<compile_context>
chip_gen: v5e
topology: v5e:2x2
jax: 0.10.0
libtpu: 0.0.40
codegen_flags: <defaults>
</compile_context>

<pallas_src>
import functools

import jax
import jax.numpy as jnp
from jax import lax
from jax.experimental import pallas as pl
from jax.experimental.pallas import tpu as pltpu

_NEG_LARGE = -1e30  # finite stand-in for -inf (avoids -inf - -inf = nan corner cases)


def _clip_pooler_kernel(h_ref, w_ref, b_ref, o_ref, m_ref, l_ref, *,
                        seq_len, seq_tile):
    """One (batch-tile, seq-tile) grid step of logsumexp -> dense -> tanh.

    h_ref: (TB, TS, H) input tile (native dtype)
    w_ref: (H, H)      dense weight, pre-transposed to (in, out) layout
    b_ref: (1, H)      bias
    o_ref: (TB, H)     output tile
    m_ref/l_ref: (TB, H) f32 scratch -- running max / running scaled exp-sum
    """
    k = pl.program_id(1)
    last = pl.num_programs(1) - 1

    @pl.when(k == 0)
    def _init():
        m_ref[...] = jnp.full_like(m_ref, _NEG_LARGE)
        l_ref[...] = jnp.zeros_like(l_ref)

    def _lse_update(h):
        # Running-max update: max is exact in bf16/f32, so compute it on the
        # native dtype (no full-tile f32 copy just for the max).
        tile_max = jnp.max(h, axis=1).astype(jnp.float32)              # (TB, H)
        m_prev = m_ref[...]
        m_new = jnp.maximum(m_prev, tile_max)
        # f32 upcast fused into the exp operand (no standalone f32 tile temp).
        p_sum = jnp.sum(jnp.exp(h.astype(jnp.float32) - m_new[:, None, :]),
                        axis=1)                                        # (TB, H)
        l_ref[...] = jnp.exp(m_prev - m_new) * l_ref[...] + p_sum
        m_ref[...] = m_new

    if seq_len % seq_tile == 0:
        _lse_update(h_ref[...])                  # hot path: never masked
    else:
        @pl.when(k != last)
        def _body():
            _lse_update(h_ref[...])              # hot path: never masked

        @pl.when(k == last)
        def _tail():
            # Only the final seq tile pays for the iota/compare/select mask.
            h = h_ref[...].astype(jnp.float32)
            seq_idx = k * seq_tile + lax.broadcasted_iota(jnp.int32, h.shape, 1)
            _lse_update(jnp.where(seq_idx < seq_len, h, _NEG_LARGE))

    @pl.when(k == last)
    def _finalize():
        lse = m_ref[...] + jnp.log(l_ref[...])                         # (TB, H)
        # Weight is (in, out): plain row-major matmul, no in-kernel transpose.
        y = lax.dot_general(
            lse.astype(w_ref.dtype), w_ref[...],
            dimension_numbers=(((1,), (0,)), ((), ())),
            preferred_element_type=jnp.float32)                        # (TB, H)
        y = y + b_ref[...].astype(jnp.float32)
        o_ref[...] = jnp.tanh(y).astype(o_ref.dtype)


def _tpu_hw_info():
    """Returns (vmem_capacity_bytes, max_batch_tile, tensorcores_per_chip)."""
    vmem_cap = 128 * 1024 * 1024
    try:
        vmem_cap = int(pltpu.get_tpu_info().vmem_capacity_bytes)
    except Exception:
        pass
    kind = ""
    try:
        kind = jax.devices()[0].device_kind.lower()
    except Exception:
        pass
    max_tb = 256
    num_cores = 1
    if ("v5 lite" in kind) or ("v5e" in kind) or ("v5lite" in kind):
        max_tb = 128                  # v5e MXU is 4x128^2: M=256 buys nothing
    if ("v7" in kind) or ("7x" in kind):
        num_cores = 2                 # 2 TensorCores per chip (megacore)
        vmem_cap = min(vmem_cap, 64 * 1024 * 1024)   # 64 MiB per TC on v7x
    return vmem_cap, max_tb, num_cores


def _pick_batch_tile(batch, *, max_tile=256, num_cores=1):
    if batch < 128:
        return batch                  # single full block (block == full dim is legal)
    tile = min(max_tile, 256)
    if num_cores > 1:
        # v7x megacore: keep >= num_cores batch blocks so both TCs get work.
        tile = min(tile, max(128, pl.cdiv(batch, num_cores)))
    tile = min(tile, batch)
    return max(8, (tile // 8) * 8)    # sublane-aligned output rows


def _pick_seq_tile(seq, tb, hidden, *, in_itemsize, out_itemsize, w_itemsize,
                   vmem_limit):
    """Largest seq tile whose whole VMEM plan fits under vmem_limit."""
    sublane = {4: 8, 2: 16, 1: 32}.get(in_itemsize, 8)
    # Fixed (non-streaming) VMEM: weight (counted double-buffered so the plan
    # is safe even when single-buffering is unavailable), bias, double-buffered
    # output tile, and the two f32 accumulators.
    fixed = (2 * hidden * hidden * w_itemsize
             + 2 * hidden * 4
             + 2 * tb * hidden * out_itemsize
             + 2 * tb * hidden * 4)
    stream = vmem_limit - fixed - (2 << 20)        # ~2 MiB compiler slack
    # Per seq element: double-buffered native input block plus ~2 full-tile f32
    # temporaries inside the kernel (exp operand + exp result).
    per_ts = tb * hidden * (2 * in_itemsize + 2 * 4)
    max_ts = max(stream // per_ts, sublane)
    if seq <= max_ts:
        return seq                                 # whole sequence in one tile
    ts = min(seq, max(sublane, (max_ts // sublane) * sublane))
    # Prefer a tile that divides seq (removes the masked tail step entirely) as
    # long as it costs at most ~2x in tile size.
    lo = max(ts // 2, sublane)
    for cand in range(ts, lo - 1, -sublane):
        if seq % cand == 0:
            return cand
    return ts


def _build_pooler_call(shape, out_dtype, tb, ts, vmem_limit, cost, kernel, *,
                       single_buffer_resident):
    B, S, H = shape
    grid = (pl.cdiv(B, tb), pl.cdiv(S, ts))
    # Weight/bias never change across the grid; one VMEM copy is enough.
    resident = ({"pipeline_mode": pl.Buffered(buffer_count=1)}
                if single_buffer_resident else {})
    return pl.pallas_call(
        kernel,
        out_shape=jax.ShapeDtypeStruct((B, H), out_dtype),
        grid_spec=pltpu.PrefetchScalarGridSpec(
            num_scalar_prefetch=0,
            grid=grid,
            in_specs=[
                # perf: on v6e, sweep pipeline_mode=pl.Buffered(3) here if the
                # profile still shows exposed DMA after enlarging tiles.
                pl.BlockSpec((tb, ts, H), lambda i, k: (i, k, 0)),
                pl.BlockSpec((H, H), lambda i, k: (0, 0), **resident),
                pl.BlockSpec((1, H), lambda i, k: (0, 0), **resident),
            ],
            out_specs=pl.BlockSpec((tb, H), lambda i, k: (i, 0)),
            scratch_shapes=[
                pltpu.VMEM((tb, H), jnp.float32),  # running max
                pltpu.VMEM((tb, H), jnp.float32),  # running scaled exp-sum
            ],
        ),
        compiler_params=pltpu.CompilerParams(
            dimension_semantics=("parallel", "arbitrary"),
            vmem_limit_bytes=int(vmem_limit)),
        cost_estimate=cost,
    )


def bert_clip_pooler(hidden_states, weight, bias, *, batch_tile=None,
                     seq_tile=None, cast_weight_to_bf16=False):
    """hidden_states: (B, S, H); weight: (H, H) nn.Linear (out, in); bias: (H,)."""
    B, S, H = hidden_states.shape

    vmem_cap, max_tb, num_cores = _tpu_hw_info()
    # ~75% of physical VMEM, capped at 100 MiB: ~96 MiB on v5e/v6e, ~48 MiB on v7x.
    vmem_limit = min((vmem_cap * 3) // 4, 100 * 1024 * 1024)

    # Optional one-time weight cast (halves resident VMEM, fast bf16 MXU path);
    # off by default to preserve f32 numerics.
    w = weight.astype(jnp.bfloat16) if cast_weight_to_bf16 else weight
    # One-time HBM transpose to (in, out): negligible vs the B*S*H stream, and
    # it removes any per-batch-tile transpose of the HxH weight in the kernel.
    w_t = w.T
    b2 = bias.reshape(1, H)                       # keep bias 2-D for TPU layout

    tb = batch_tile or _pick_batch_tile(B, max_tile=max_tb, num_cores=num_cores)
    ts = seq_tile or _pick_seq_tile(
        S, tb, H,
        in_itemsize=hidden_states.dtype.itemsize,
        out_itemsize=hidden_states.dtype.itemsize,
        w_itemsize=w_t.dtype.itemsize,
        vmem_limit=vmem_limit)

    n_seq_steps = pl.cdiv(S, ts)
    in_b = hidden_states.dtype.itemsize
    cost = pl.CostEstimate(
        flops=2 * B * S * H + 2 * B * H * H,
        transcendentals=B * S * H + B * H * (n_seq_steps + 2),
        bytes_accessed=(B * S * H * in_b + H * H * w_t.dtype.itemsize
                        + H * bias.dtype.itemsize + B * H * in_b),
    )

    kernel = functools.partial(_clip_pooler_kernel, seq_len=S, seq_tile=ts)

    last_err = None
    for single_buffer_resident in (True, False):
        try:
            call = _build_pooler_call(
                (B, S, H), hidden_states.dtype, tb, ts, vmem_limit, cost, kernel,
                single_buffer_resident=single_buffer_resident)
            return jax.block_until_ready(call(hidden_states, w_t, b2))
        except Exception as err:  # Buffered(1) unsupported -> default buffering
            last_err = err
    raise last_err


def bert_clip_pooler_ref(hidden_states, weight, bias):
    x = hidden_states.astype(jnp.float32)
    m = jnp.max(x, axis=1, keepdims=True)
    lse = jnp.log(jnp.sum(jnp.exp(x - m), axis=1)) + m[:, 0, :]
    return jnp.tanh(lse @ weight.T.astype(jnp.float32) + bias.astype(jnp.float32))


if __name__ == "__main__":
    B, S, H = 2, 8, 32  # small shapes consistent with the module's forward

    key = jax.random.PRNGKey(0)
    k_h, k_w, k_b = jax.random.split(key, 3)
    hidden_states = jax.random.normal(k_h, (B, S, H), dtype=jnp.float32)
    # Deterministic synthetic Linear(hidden, hidden) params (PyTorch layout: (out, in)).
    weight = jax.random.normal(k_w, (H, H), dtype=jnp.float32) * 0.02
    bias = jax.random.normal(k_b, (H,), dtype=jnp.float32) * 0.02

    out = bert_clip_pooler(hidden_states, weight, bias)
    out = jax.block_until_ready(out)

    ref = bert_clip_pooler_ref(hidden_states, weight, bias)
    assert out.shape == (B, H)
    assert jnp.allclose(out, ref, atol=1e-4, rtol=1e-4), "mismatch vs reference"

    print("KERNEL_OK")
</pallas_src>

<mosaic_0001>
module attributes {stable_mosaic.version = 11 : i64} {
  func.func @_clip_pooler_kernel(%arg0: i32, %arg1: i32, %arg2: memref<2x8x32xf32, #tpu.memory_space<vmem>>, %arg3: memref<32x32xf32, #tpu.memory_space<vmem>>, %arg4: memref<1x32xf32, #tpu.memory_space<vmem>>, %arg5: memref<2x32xf32, #tpu.memory_space<vmem>>, %arg6: memref<2x32xf32, #tpu.memory_space<vmem>>, %arg7: memref<2x32xf32, #tpu.memory_space<vmem>>) attributes {dimension_semantics = [#tpu.dimension_semantics<parallel>, #tpu.dimension_semantics<arbitrary>], iteration_bounds = array<i64: 1, 1>, scalar_prefetch = 0 : i64, scratch_operands = 2 : i64, tpu.core_type = #tpu.core_type<tc>, window_params = [{transform_indices = @transform_0, window_bounds = array<i64: 2, 8, 32>}, {pipeline_mode = #tpu.pipeline_mode<synchronous>, transform_indices = @transform_1, window_bounds = array<i64: 32, 32>}, {pipeline_mode = #tpu.pipeline_mode<synchronous>, transform_indices = @transform_2, window_bounds = array<i64: 1, 32>}, {transform_indices = @transform_3, window_bounds = array<i64: 2, 32>}]} {
    %c0_i32 = arith.constant 0 : i32
    %0 = arith.cmpi eq, %arg1, %c0_i32 : i32
    %1 = arith.extui %0 : i1 to i32
    %c0_i32_0 = arith.constant 0 : i32
    %2 = arith.cmpi ne, %1, %c0_i32_0 : i32
    scf.if %2 {
      %cst_14 = arith.constant -1.000000e+30 : f32
      %22 = vector.broadcast %cst_14 : f32 to vector<2x32xf32>
      %c0_15 = arith.constant 0 : index
      %c0_16 = arith.constant 0 : index
      %23 = vector.load %arg6[%c0_15, %c0_16] : memref<2x32xf32, #tpu.memory_space<vmem>>, vector<2x32xf32>
      tpu.vector_store %arg6[%c0_15, %c0_16], %22 {strides = array<i32>} : memref<2x32xf32, #tpu.memory_space<vmem>>, vector<2x32xf32>,
      %cst_17 = arith.constant 0.000000e+00 : f32
      %24 = vector.broadcast %cst_17 : f32 to vector<2x32xf32>
      %c0_18 = arith.constant 0 : index
      %c0_19 = arith.constant 0 : index
      %25 = vector.load %arg7[%c0_18, %c0_19] : memref<2x32xf32, #tpu.memory_space<vmem>>, vector<2x32xf32>
      tpu.vector_store %arg7[%c0_18, %c0_19], %24 {strides = array<i32>} : memref<2x32xf32, #tpu.memory_space<vmem>>, vector<2x32xf32>,
    } else {
    }
    %c0 = arith.constant 0 : index
    %c0_1 = arith.constant 0 : index
    %c0_2 = arith.constant 0 : index
    %3 = vector.load %arg2[%c0, %c0_1, %c0_2] : memref<2x8x32xf32, #tpu.memory_space<vmem>>, vector<2x8x32xf32>
    %cst = arith.constant dense<0xFF800000> : vector<2x32xf32>
    %4 = vector.multi_reduction <maximumf>, %3, %cst [1] : vector<2x8x32xf32> to vector<2x32xf32>
    %c0_3 = arith.constant 0 : index
    %c0_4 = arith.constant 0 : index
    %5 = vector.load %arg6[%c0_3, %c0_4] : memref<2x32xf32, #tpu.memory_space<vmem>>, vector<2x32xf32>
    %6 = arith.maximumf %5, %4 : vector<2x32xf32>
    %7 = vector.shape_cast %6 : vector<2x32xf32> to vector<2x1x32xf32>
    %8 = vector.broadcast %7 : vector<2x1x32xf32> to vector<2x8x32xf32>
    %9 = arith.subf %3, %8 : vector<2x8x32xf32>
    %10 = math.exp %9 : vector<2x8x32xf32>
    %cst_5 = arith.constant dense<0.000000e+00> : vector<2x32xf32>
    %11 = vector.multi_reduction <add>, %10, %cst_5 [1] : vector<2x8x32xf32> to vector<2x32xf32>
    %12 = arith.subf %5, %6 : vector<2x32xf32>
    %13 = math.exp %12 : vector<2x32xf32>
    %c0_6 = arith.constant 0 : index
    %c0_7 = arith.constant 0 : index
    %14 = vector.load %arg7[%c0_6, %c0_7] : memref<2x32xf32, #tpu.memory_space<vmem>>, vector<2x32xf32>
    %15 = arith.mulf %13, %14 : vector<2x32xf32>
    %16 = arith.addf %15, %11 : vector<2x32xf32>
    %c0_8 = arith.constant 0 : index
    %c0_9 = arith.constant 0 : index
    %17 = vector.load %arg7[%c0_8, %c0_9] : memref<2x32xf32, #tpu.memory_space<vmem>>, vector<2x32xf32>
    tpu.vector_store %arg7[%c0_8, %c0_9], %16 {strides = array<i32>} : memref<2x32xf32, #tpu.memory_space<vmem>>, vector<2x32xf32>,
    %c0_10 = arith.constant 0 : index
    %c0_11 = arith.constant 0 : index
    %18 = vector.load %arg6[%c0_10, %c0_11] : memref<2x32xf32, #tpu.memory_space<vmem>>, vector<2x32xf32>
    tpu.vector_store %arg6[%c0_10, %c0_11], %6 {strides = array<i32>} : memref<2x32xf32, #tpu.memory_space<vmem>>, vector<2x32xf32>,
    %c0_i32_12 = arith.constant 0 : i32
    %19 = arith.cmpi eq, %arg1, %c0_i32_12 : i32
    %20 = arith.extui %19 : i1 to i32
    %c0_i32_13 = arith.constant 0 : i32
    %21 = arith.cmpi ne, %20, %c0_i32_13 : i32
    scf.if %21 {
      %c0_14 = arith.constant 0 : index
      %c0_15 = arith.constant 0 : index
      %22 = vector.load %arg6[%c0_14, %c0_15] : memref<2x32xf32, #tpu.memory_space<vmem>>, vector<2x32xf32>
      %c0_16 = arith.constant 0 : index
      %c0_17 = arith.constant 0 : index
      %23 = vector.load %arg7[%c0_16, %c0_17] : memref<2x32xf32, #tpu.memory_space<vmem>>, vector<2x32xf32>
      %24 = math.log %23 : vector<2x32xf32>
      %25 = arith.addf %22, %24 : vector<2x32xf32>
      %c0_18 = arith.constant 0 : index
      %c0_19 = arith.constant 0 : index
      %26 = vector.load %arg3[%c0_18, %c0_19] : memref<32x32xf32, #tpu.memory_space<vmem>>, vector<32x32xf32>
      %cst_20 = arith.constant dense<0.000000e+00> : vector<2x32xf32>
      %27 = tpu.matmul %25, %26, %cst_20 {dimension_numbers = #tpu.dot_dimension_numbers<[1], [0], [0], [1], [0, 0, 1, 1], [], []>} : vector<2x32xf32>, vector<32x32xf32>, vector<2x32xf32> -> vector<2x32xf32>
      %c0_21 = arith.constant 0 : index
      %c0_22 = arith.constant 0 : index
      %28 = vector.load %arg4[%c0_21, %c0_22] : memref<1x32xf32, #tpu.memory_space<vmem>>, vector<1x32xf32>
      %29 = vector.broadcast %28 : vector<1x32xf32> to vector<2x32xf32>
      %30 = arith.addf %27, %29 : vector<2x32xf32>
      %31 = math.tanh %30 : vector<2x32xf32>
      %c0_23 = arith.constant 0 : index
      %c0_24 = arith.constant 0 : index
      %32 = vector.load %arg5[%c0_23, %c0_24] : memref<2x32xf32, #tpu.memory_space<vmem>>, vector<2x32xf32>
      tpu.vector_store %arg5[%c0_23, %c0_24], %31 {strides = array<i32>} : memref<2x32xf32, #tpu.memory_space<vmem>>, vector<2x32xf32>,
    } else {
    }
    return
  }
  func.func @transform_0(%arg0: i32, %arg1: i32) -> (i32, i32, i32) {
    %c0_i32 = arith.constant 0 : i32
    %c0_i32_0 = arith.constant 0 : i32
    return %arg0, %arg1, %c0_i32 : i32, i32, i32
  }
  func.func @transform_1(%arg0: i32, %arg1: i32) -> (i32, i32) {
    %c0_i32 = arith.constant 0 : i32
    %c0_i32_0 = arith.constant 0 : i32
    %c0_i32_1 = arith.constant 0 : i32
    return %c0_i32, %c0_i32_0 : i32, i32
  }
  func.func @transform_2(%arg0: i32, %arg1: i32) -> (i32, i32) {
    %c0_i32 = arith.constant 0 : i32
    %c0_i32_0 = arith.constant 0 : i32
    %c0_i32_1 = arith.constant 0 : i32
    return %c0_i32, %c0_i32_0 : i32, i32
  }
  func.func @transform_3(%arg0: i32, %arg1: i32) -> (i32, i32) {
    %c0_i32 = arith.constant 0 : i32
    %c0_i32_0 = arith.constant 0 : i32
    return %arg0, %c0_i32 : i32, i32
  }
}

module attributes {stable_mosaic.version = 11 : i64} {
  func.func @_clip_pooler_kernel(%arg0: i32, %arg1: i32, %arg2: memref<2x8x32xf32, #tpu.memory_space<vmem>>, %arg3: memref<32x32xf32, #tpu.memory_space<vmem>>, %arg4: memref<1x32xf32, #tpu.memory_space<vmem>>, %arg5: memref<2x32xf32, #tpu.memory_space<vmem>>, %arg6: memref<2x32xf32, #tpu.memory_space<vmem>>, %arg7: memref<2x32xf32, #tpu.memory_space<vmem>>) attributes {dimension_semantics = [#tpu.dimension_semantics<parallel>, #tpu.dimension_semantics<arbitrary>], iteration_bounds = array<i64: 1, 1>, scalar_prefetch = 0 : i64, scratch_operands = 2 : i64, tpu.core_type = #tpu.core_type<tc>, window_params = [{transform_indices = @transform_0, window_bounds = array<i64: 2, 8, 32>}, {pipeline_mode = #tpu.pipeline_mode<synchronous>, transform_indices = @transform_1, window_bounds = array<i64: 32, 32>}, {pipeline_mode = #tpu.pipeline_mode<synchronous>, transform_indices = @transform_2, window_bounds = array<i64: 1, 32>}, {transform_indices = @transform_3, window_bounds = array<i64: 2, 32>}]} {
    %c0_i32 = arith.constant 0 : i32
    %0 = arith.cmpi eq, %arg1, %c0_i32 : i32
    %1 = arith.extui %0 : i1 to i32
    %c0_i32_0 = arith.constant 0 : i32
    %2 = arith.cmpi ne, %1, %c0_i32_0 : i32
    scf.if %2 {
      %cst_14 = arith.constant -1.000000e+30 : f32
      %22 = vector.broadcast %cst_14 : f32 to vector<2x32xf32>
      %c0_15 = arith.constant 0 : index
      %c0_16 = arith.constant 0 : index
      %23 = vector.load %arg6[%c0_15, %c0_16] : memref<2x32xf32, #tpu.memory_space<vmem>>, vector<2x32xf32>
      tpu.vector_store %arg6[%c0_15, %c0_16], %22 {strides = array<i32>} : memref<2x32xf32, #tpu.memory_space<vmem>>, vector<2x32xf32>,
      %cst_17 = arith.constant 0.000000e+00 : f32
      %24 = vector.broadcast %cst_17 : f32 to vector<2x32xf32>
      %c0_18 = arith.constant 0 : index
      %c0_19 = arith.constant 0 : index
      %25 = vector.load %arg7[%c0_18, %c0_19] : memref<2x32xf32, #tpu.memory_space<vmem>>, vector<2x32xf32>
      tpu.vector_store %arg7[%c0_18, %c0_19], %24 {strides = array<i32>} : memref<2x32xf32, #tpu.memory_space<vmem>>, vector<2x32xf32>,
    } else {
    }
    %c0 = arith.constant 0 : index
    %c0_1 = arith.constant 0 : index
    %c0_2 = arith.constant 0 : index
    %3 = vector.load %arg2[%c0, %c0_1, %c0_2] : memref<2x8x32xf32, #tpu.memory_space<vmem>>, vector<2x8x32xf32>
    %cst = arith.constant dense<0xFF800000> : vector<2x32xf32>
    %4 = vector.multi_reduction <maximumf>, %3, %cst [1] : vector<2x8x32xf32> to vector<2x32xf32>
    %c0_3 = arith.constant 0 : index
    %c0_4 = arith.constant 0 : index
    %5 = vector.load %arg6[%c0_3, %c0_4] : memref<2x32xf32, #tpu.memory_space<vmem>>, vector<2x32xf32>
    %6 = arith.maximumf %5, %4 : vector<2x32xf32>
    %7 = vector.shape_cast %6 : vector<2x32xf32> to vector<2x1x32xf32>
    %8 = vector.broadcast %7 : vector<2x1x32xf32> to vector<2x8x32xf32>
    %9 = arith.subf %3, %8 : vector<2x8x32xf32>
    %10 = math.exp %9 : vector<2x8x32xf32>
    %cst_5 = arith.constant dense<0.000000e+00> : vector<2x32xf32>
    %11 = vector.multi_reduction <add>, %10, %cst_5 [1] : vector<2x8x32xf32> to vector<2x32xf32>
    %12 = arith.subf %5, %6 : vector<2x32xf32>
    %13 = math.exp %12 : vector<2x32xf32>
    %c0_6 = arith.constant 0 : index
    %c0_7 = arith.constant 0 : index
    %14 = vector.load %arg7[%c0_6, %c0_7] : memref<2x32xf32, #tpu.memory_space<vmem>>, vector<2x32xf32>
    %15 = arith.mulf %13, %14 : vector<2x32xf32>
    %16 = arith.addf %15, %11 : vector<2x32xf32>
    %c0_8 = arith.constant 0 : index
    %c0_9 = arith.constant 0 : index
    %17 = vector.load %arg7[%c0_8, %c0_9] : memref<2x32xf32, #tpu.memory_space<vmem>>, vector<2x32xf32>
    tpu.vector_store %arg7[%c0_8, %c0_9], %16 {strides = array<i32>} : memref<2x32xf32, #tpu.memory_space<vmem>>, vector<2x32xf32>,
    %c0_10 = arith.constant 0 : index
    %c0_11 = arith.constant 0 : index
    %18 = vector.load %arg6[%c0_10, %c0_11] : memref<2x32xf32, #tpu.memory_space<vmem>>, vector<2x32xf32>
    tpu.vector_store %arg6[%c0_10, %c0_11], %6 {strides = array<i32>} : memref<2x32xf32, #tpu.memory_space<vmem>>, vector<2x32xf32>,
    %c0_i32_12 = arith.constant 0 : i32
    %19 = arith.cmpi eq, %arg1, %c0_i32_12 : i32
    %20 = arith.extui %19 : i1 to i32
    %c0_i32_13 = arith.constant 0 : i32
    %21 = arith.cmpi ne, %20, %c0_i32_13 : i32
    scf.if %21 {
      %c0_14 = arith.constant 0 : index
      %c0_15 = arith.constant 0 : index
      %22 = vector.load %arg6[%c0_14, %c0_15] : memref<2x32xf32, #tpu.memory_space<vmem>>, vector<2x32xf32>
      %c0_16 = arith.constant 0 : index
      %c0_17 = arith.constant 0 : index
      %23 = vector.load %arg7[%c0_16, %c0_17] : memref<2x32xf32, #tpu.memory_space<vmem>>, vector<2x32xf32>
      %24 = math.log %23 : vector<2x32xf32>
      %25 = arith.addf %22, %24 : vector<2x32xf32>
      %c0_18 = arith.constant 0 : index
      %c0_19 = arith.constant 0 : index
      %26 = vector.load %arg3[%c0_18, %c0_19] : memref<32x32xf32, #tpu.memory_space<vmem>>, vector<32x32xf32>
      %cst_20 = arith.constant dense<0.000000e+00> : vector<2x32xf32>
      %27 = tpu.matmul %25, %26, %cst_20 {dimension_numbers = #tpu.dot_dimension_numbers<[1], [0], [0], [1], [0, 0, 1, 1], [], []>} : vector<2x32xf32>, vector<32x32xf32>, vector<2x32xf32> -> vector<2x32xf32>
      %c0_21 = arith.constant 0 : index
      %c0_22 = arith.constant 0 : index
      %28 = vector.load %arg4[%c0_21, %c0_22] : memref<1x32xf32, #tpu.memory_space<vmem>>, vector<1x32xf32>
      %29 = vector.broadcast %28 : vector<1x32xf32> to vector<2x32xf32>
      %30 = arith.addf %27, %29 : vector<2x32xf32>
      %31 = math.tanh %30 : vector<2x32xf32>
      %c0_23 = arith.constant 0 : index
      %c0_24 = arith.constant 0 : index
      %32 = vector.load %arg5[%c0_23, %c0_24] : memref<2x32xf32, #tpu.memory_space<vmem>>, vector<2x32xf32>
      tpu.vector_store %arg5[%c0_23, %c0_24], %31 {strides = array<i32>} : memref<2x32xf32, #tpu.memory_space<vmem>>, vector<2x32xf32>,
    } else {
    }
    return
  }
  func.func @transform_0(%arg0: i32, %arg1: i32) -> (i32, i32, i32) {
    %c0_i32 = arith.constant 0 : i32
    %c0_i32_0 = arith.constant 0 : i32
    return %arg0, %arg1, %c0_i32 : i32, i32, i32
  }
  func.func @transform_1(%arg0: i32, %arg1: i32) -> (i32, i32) {
    %c0_i32 = arith.constant 0 : i32
    %c0_i32_0 = arith.constant 0 : i32
    %c0_i32_1 = arith.constant 0 : i32
    return %c0_i32, %c0_i32_0 : i32, i32
  }
  func.func @transform_2(%arg0: i32, %arg1: i32) -> (i32, i32) {
    %c0_i32 = arith.constant 0 : i32
    %c0_i32_0 = arith.constant 0 : i32
    %c0_i32_1 = arith.constant 0 : i32
    return %c0_i32, %c0_i32_0 : i32, i32
  }
  func.func @transform_3(%arg0: i32, %arg1: i32) -> (i32, i32) {
    %c0_i32 = arith.constant 0 : i32
    %c0_i32_0 = arith.constant 0 : i32
    return %arg0, %c0_i32 : i32, i32
  }
}

</mosaic_0001>

<bundles_post_ra>
// kernel: tpu_custom_call.1
= control target key start
LH: loop header
LB: loop body
LE: loop exit
PB: predicated region body
PF: predicated region fallthrough
CT: control target
= control target key end

     0   :  { %8 = vsyncpa [#allocation5], 0  ;;  %s324_s0 = inlined_call_operand.hbm [shape: f32[2,8,32], index: 0, kind: input, shape index: {}]   ;;  %s325_s1 = inlined_call_operand.hbm [shape: f32[32,32], index: 1, kind: input, shape index: {}]   ;;  %s326_s2 = inlined_call_operand.vmem [shape: f32[1,32], index: 2, kind: input, shape index: {}]   ;;  %s327_s3 = inlined_call_operand.hbm [shape: f32[2,32], index: 3, kind: output, shape index: {}]  }
   0x1   :  { %9 = vsyncpa [#allocation8], 0 }
   0x2   :  { %10 = vsyncpa [#allocation6], 0  ;;  %s15_s14 = sshll.u32 %s324_s0, 4  ;;  %s273_s15 = smov [#allocation4]   ;;  %s16_s14 = int_to_ptr.hbm [resolvable:$true] %s15_s14 }
   0x3   :  { %s17_s16 = sshll.u32 %s273_s15, 4  ;;  %s28_s19 = sshll.u32 %s325_s1, 4  ;;  %s18_s16 = int_to_ptr.vmem [resolvable:$true] %s17_s16  ;;  %s29_s19 = int_to_ptr.hbm [resolvable:$true] %s28_s19 }
   0x4   :  { %s274_s20 = smov 128   ;;  %s275_s21 = smov 8  }
   0x5   :  { %23 = dma.hbm_to_vmem [thread:$0]  %s16_s14, 256, %s18_s16, [#allocation5], %s274_s20, %s274_s20, %s275_s21  }
   0x6   :  { %s276_s22 = smov [#allocation7]  }
   0x7   :  { %s30_s23 = sshll.u32 %s276_s22, 4  ;;  %s31_s23 = int_to_ptr.vmem [resolvable:$true] %s30_s23 }
   0x8   :  { %36 = dma.hbm_to_vmem [thread:$0]  %s29_s19, 512, %s31_s23, [#allocation8], %s274_s20, %s274_s20, %s275_s21  }
   0x9   :  { %267 = dma.done.wait [#allocation5], 256  }
   0xa   :  { %268 = vsyncadd [#allocation5], 4294967040 }
   0xb   :  { %269 = dma.done.wait [#allocation8], 512  }
   0xc   :  { %270 = vsyncadd [#allocation8], 4294966784  ;;  %vm51_vm0 = vcmask 254976   ;;  %v277_v0 = vmov -1e+30   ;;  %v278_v1 = vmov 0.0  }
   0xd   :  { %52 = vst.msk [vmem:[#allocation2] sm:$0x3] %vm51_vm0, %v277_v0  ;;  %vm56_vm1 = vcmask 261120   ;;  %v128_v2 = vld [vmem:[#allocation7 + $0x18] sm:$0xff]  ;;  %v127_v3 = vld [vmem:[#allocation7 + $0x10] sm:$0xff]  ;;  %v126_v6 = vld [vmem:[#allocation7 + $0x8] sm:$0xff] }
   0xe   :  { %53 = vst.msk [vmem:[#allocation3] sm:$0x3] %vm51_vm0, %v278_v1  ;;  %148 = vmatpush.msra.mxu0 %v128_v2  ;;  %v54_v4 = vld [vmem:[#allocation4] sm:$0xff]  ;;  %v55_v5 = vld [vmem:[#allocation4 + $0x8] sm:$0xff]  ;;  %v125_v11 = vld [vmem:[#allocation7] sm:$0xff]  ;;  %vm74_vm2 = vcmask 1041409  }
   0xf   :  { %v57_v7 = vsel %vm56_vm1, %v54_v4, -inf  ;;  %v64_v8 = vsel %vm56_vm1, %v55_v5, -inf  ;;  %v184_v60 = vld [vmem:[%s326_s2] ss:$0 sm:$0xff]  ;;  %s279_s24 = smov [#allocation9]   ;;  %s165_s28 = sshll.u32 %s327_s3, 4  ;;  %s166_s28 = int_to_ptr.hbm [resolvable:$true] %s165_s28 }
  0x10   :  { %149 = vmatpush.msra.mxu0 %v127_v3  ;;  %v58_v9 = vrot.slane %v57_v7, 4  ;;  %v65_v10 = vrot.slane %v64_v8, 4  ;;  %s163_s25 = sshll.u32 %s279_s24, 4  ;;  %s164_s25 = int_to_ptr.vmem [resolvable:$true] %s163_s25 }
  0x12   :  { %150 = vmatpush.msra.mxu0 %v126_v6  ;;  %v59_v12 = vmax.f32 %v57_v7, %v58_v9  ;;  %v66_v13 = vmax.f32 %v64_v8, %v65_v10 }
  0x14   :  { %151 = vmatpush.msra.mxu0 %v125_v11  ;;  %v60_v14 = vrot.slane %v59_v12, 2  ;;  %v67_v15 = vrot.slane %v66_v13, 2  ;;  %v71_v22 = vld [vmem:[#allocation2] sm:$0x3] }
  0x15   :  { %v107_v48 = vld [vmem:[#allocation3] sm:$0x3] }
  0x16   :  { %v61_v16 = vmax.f32 %v59_v12, %v60_v14  ;;  %v68_v17 = vmax.f32 %v66_v13, %v67_v15 }
  0x18   :  { %v62_v18 = vrot.slane %v61_v16, 1  ;;  %v69_v19 = vrot.slane %v68_v17, 1 }
  0x1a   :  { %v63_v20 = vmax.f32 %v61_v16, %v62_v18  ;;  %v70_v21 = vmax.f32 %v68_v17, %v69_v19 }
  0x1c   :  { %v75_v23 = vsel %vm74_vm2, %v70_v21, %v63_v20 }
  0x1d   :  { %v77_v24 = vmax.f32 %v71_v22, %v75_v23 }
  0x1f   :  { %v79_v25 = vrot.slane %v77_v24, 1  ;;  %v80_v26 = vperm.slane %v77_v24, 0  ;;  %116 = vst.msk [vmem:[#allocation2] sm:$0x3] %vm51_vm0, %v77_v24  ;;  %v104_v32 = vsub.f32 %v71_v22, %v77_v24 }
  0x21   :  { %v81_v27 = vperm.slane %v79_v25, 0  ;;  %v84_v28 = vsub.f32 %v54_v4, %v80_v26  ;;  %v105_v34 = vmul.f32 1.442695, %v104_v32 }
  0x23   :  { %v85_v29 = vsub.f32 %v55_v5, %v81_v27  ;;  %v86_v30 = vmul.f32 1.442695, %v84_v28 }
  0x25   :  { %185 = vpow2.f32 %v86_v30  ;;  %v88_v31 = vmul.f32 1.442695, %v85_v29 }
  0x26   :  { %v120_v57 = vld [vmem:[#allocation2] sm:$0x3] }
  0x27   :  { %187 = vpow2.f32 %v88_v31 }
  0x28   :  { %189 = vpow2.f32 %v105_v34 }
  0x2b   :  { %v186_v33 = vpop.eup %185 }
  0x2c   :  { %v90_v35 = vsel %vm56_vm1, %v186_v33, 0.0 }
  0x2d   :  { %v188_v36 = vpop.eup %187  ;;  %v91_v37 = vrot.slane %v90_v35, 4 }
  0x2e   :  { %v97_v38 = vsel %vm56_vm1, %v188_v36, 0.0  ;;  %v190_v45 = vpop.eup %189 }
  0x2f   :  { %v92_v39 = vadd.f32 %v91_v37, %v90_v35  ;;  %v98_v40 = vrot.slane %v97_v38, 4  ;;  %v108_v51 = vmul.f32 %v190_v45, %v107_v48 }
  0x31   :  { %v93_v41 = vrot.slane %v92_v39, 2  ;;  %v99_v42 = vadd.f32 %v98_v40, %v97_v38 }
  0x33   :  { %v94_v43 = vadd.f32 %v93_v41, %v92_v39  ;;  %v100_v44 = vrot.slane %v99_v42, 2 }
  0x35   :  { %v95_v46 = vrot.slane %v94_v43, 1  ;;  %v101_v47 = vadd.f32 %v100_v44, %v99_v42 }
  0x37   :  { %v96_v49 = vadd.f32 %v95_v46, %v94_v43  ;;  %v102_v50 = vrot.slane %v101_v47, 1 }
  0x39   :  { %v103_v52 = vadd.f32 %v102_v50, %v101_v47 }
  0x3b   :  { %v111_v53 = vsel %vm74_vm2, %v103_v52, %v96_v49 }
  0x3c   :  { %v113_v54 = vadd.f32 %v111_v53, %v108_v51 }
  0x3e   :  { %115 = vst.msk [vmem:[#allocation3] sm:$0x3] %vm51_vm0, %v113_v54 }
  0x45   :  { %v121_v55 = vld [vmem:[#allocation3] sm:$0x3] }
  0x46   :  { %191 = vlog2.f32 %v121_v55 }
  0x4c   :  { %v192_v56 = vpop.eup %191 }
  0x4d   :  { %v123_v58 = vmul.f32 0.6931472, %v192_v56 }
  0x4f   :  { %v124_v59 = vadd.f32 %v123_v58, %v120_v57 }
  0x51   :  { %176 = vmatmul.msk.f32.vlgmr.msra.gmra.mxu0 %vm56_vm1, %v124_v59 }
  0xce   :  { %v153_v61 = vpop.f32.mrf.mxu0 }
  0xcf   :  { %v154_v62 = vadd.f32 %v184_v60, %v153_v61 }
  0xd1   :  { %193 = vtanh.f32 %v154_v62 }
  0xd7   :  { %v194_v63 = vpop.eup %193 }
  0xd8   :  { %157 = vst.msk [vmem:[#allocation9] sm:$0x3] %vm51_vm0, %v194_v63 }
  0xd9   :  { %168 = dma.vmem_to_hbm [thread:$0]  %s164_s25, 32, %s166_s28, [#allocation6]  }
  0xda   :  { %271 = dma.done.wait [#allocation6], 32  }
  0xdb   :  { %272 = vsyncadd [#allocation6], 4294967264 }
  0xdc   :  { %173 = vsyncpa [#allocation5], 1 }
  0xdd   :  { %174 = vsyncpa [#allocation8], 1 }
  0xde   :  { %175 = vsyncpa [#allocation6], 1 }

// kernel: tpu_custom_call.1
= control target key start
LH: loop header
LB: loop body
LE: loop exit
PB: predicated region body
PF: predicated region fallthrough
CT: control target
= control target key end

     0   :  { %8 = vsyncpa [#allocation5], 0  ;;  %s324_s0 = inlined_call_operand.hbm [shape: f32[2,8,32], index: 0, kind: input, shape index: {}]   ;;  %s325_s1 = inlined_call_operand.hbm [shape: f32[32,32], index: 1, kind: input, shape index: {}]   ;;  %s326_s2 = inlined_call_operand.vmem [shape: f32[1,32], index: 2, kind: input, shape index: {}]   ;;  %s327_s3 = inlined_call_operand.hbm [shape: f32[2,32], index: 3, kind: output, shape index: {}]  }
   0x1   :  { %9 = vsyncpa [#allocation8], 0 }
   0x2   :  { %10 = vsyncpa [#allocation6], 0  ;;  %s15_s14 = sshll.u32 %s324_s0, 4  ;;  %s273_s15 = smov [#allocation4]   ;;  %s16_s14 = int_to_ptr.hbm [resolvable:$true] %s15_s14 }
   0x3   :  { %s17_s16 = sshll.u32 %s273_s15, 4  ;;  %s28_s19 = sshll.u32 %s325_s1, 4  ;;  %s18_s16 = int_to_ptr.vmem [resolvable:$true] %s17_s16  ;;  %s29_s19 = int_to_ptr.hbm [resolvable:$true] %s28_s19 }
   0x4   :  { %s274_s20 = smov 128   ;;  %s275_s21 = smov 8  }
   0x5   :  { %23 = dma.hbm_to_vmem [thread:$0]  %s16_s14, 256, %s18_s16, [#allocation5], %s274_s20, %s274_s20, %s275_s21  }
   0x6   :  { %s276_s22 = smov [#allocation7]  }
   0x7   :  { %s30_s23 = sshll.u32 %s276_s22, 4  ;;  %s31_s23 = int_to_ptr.vmem [resolvable:$true] %s30_s23 }
   0x8   :  { %36 = dma.hbm_to_vmem [thread:$0]  %s29_s19, 512, %s31_s23, [#allocation8], %s274_s20, %s274_s20, %s275_s21  }
   0x9   :  { %267 = dma.done.wait [#allocation5], 256  }
   0xa   :  { %268 = vsyncadd [#allocation5], 4294967040 }
   0xb   :  { %269 = dma.done.wait [#allocation8], 512  }
   0xc   :  { %270 = vsyncadd [#allocation8], 4294966784  ;;  %vm51_vm0 = vcmask 254976   ;;  %v277_v0 = vmov -1e+30   ;;  %v278_v1 = vmov 0.0  }
   0xd   :  { %52 = vst.msk [vmem:[#allocation2] sm:$0x3] %vm51_vm0, %v277_v0  ;;  %vm56_vm1 = vcmask 261120   ;;  %v128_v2 = vld [vmem:[#allocation7 + $0x18] sm:$0xff]  ;;  %v127_v3 = vld [vmem:[#allocation7 + $0x10] sm:$0xff]  ;;  %v126_v6 = vld [vmem:[#allocation7 + $0x8] sm:$0xff] }
   0xe   :  { %53 = vst.msk [vmem:[#allocation3] sm:$0x3] %vm51_vm0, %v278_v1  ;;  %148 = vmatpush.msra.mxu0 %v128_v2  ;;  %v54_v4 = vld [vmem:[#allocation4] sm:$0xff]  ;;  %v55_v5 = vld [vmem:[#allocation4 + $0x8] sm:$0xff]  ;;  %v125_v11 = vld [vmem:[#allocation7] sm:$0xff]  ;;  %vm74_vm2 = vcmask 1041409  }
   0xf   :  { %v57_v7 = vsel %vm56_vm1, %v54_v4, -inf  ;;  %v64_v8 = vsel %vm56_vm1, %v55_v5, -inf  ;;  %v184_v60 = vld [vmem:[%s326_s2] ss:$0 sm:$0xff]  ;;  %s279_s24 = smov [#allocation9]   ;;  %s165_s28 = sshll.u32 %s327_s3, 4  ;;  %s166_s28 = int_to_ptr.hbm [resolvable:$true] %s165_s28 }
  0x10   :  { %149 = vmatpush.msra.mxu0 %v127_v3  ;;  %v58_v9 = vrot.slane %v57_v7, 4  ;;  %v65_v10 = vrot.slane %v64_v8, 4  ;;  %s163_s25 = sshll.u32 %s279_s24, 4  ;;  %s164_s25 = int_to_ptr.vmem [resolvable:$true] %s163_s25 }
  0x12   :  { %150 = vmatpush.msra.mxu0 %v126_v6  ;;  %v59_v12 = vmax.f32 %v57_v7, %v58_v9  ;;  %v66_v13 = vmax.f32 %v64_v8, %v65_v10 }
  0x14   :  { %151 = vmatpush.msra.mxu0 %v125_v11  ;;  %v60_v14 = vrot.slane %v59_v12, 2  ;;  %v67_v15 = vrot.slane %v66_v13, 2  ;;  %v71_v22 = vld [vmem:[#allocation2] sm:$0x3] }
  0x15   :  { %v107_v48 = vld [vmem:[#allocation3] sm:$0x3] }
  0x16   :  { %v61_v16 = vmax.f32 %v59_v12, %v60_v14  ;;  %v68_v17 = vmax.f32 %v66_v13, %v67_v15 }
  0x18   :  { %v62_v18 = vrot.slane %v61_v16, 1  ;;  %v69_v19 = vrot.slane %v68_v17, 1 }
  0x1a   :  { %v63_v20 = vmax.f32 %v61_v16, %v62_v18  ;;  %v70_v21 = vmax.f32 %v68_v17, %v69_v19 }
  0x1c   :  { %v75_v23 = vsel %vm74_vm2, %v70_v21, %v63_v20 }
  0x1d   :  { %v77_v24 = vmax.f32 %v71_v22, %v75_v23 }
  0x1f   :  { %v79_v25 = vrot.slane %v77_v24, 1  ;;  %v80_v26 = vperm.slane %v77_v24, 0  ;;  %116 = vst.msk [vmem:[#allocation2] sm:$0x3] %vm51_vm0, %v77_v24  ;;  %v104_v32 = vsub.f32 %v71_v22, %v77_v24 }
  0x21   :  { %v81_v27 = vperm.slane %v79_v25, 0  ;;  %v84_v28 = vsub.f32 %v54_v4, %v80_v26  ;;  %v105_v34 = vmul.f32 1.442695, %v104_v32 }
  0x23   :  { %v85_v29 = vsub.f32 %v55_v5, %v81_v27  ;;  %v86_v30 = vmul.f32 1.442695, %v84_v28 }
  0x25   :  { %185 = vpow2.f32 %v86_v30  ;;  %v88_v31 = vmul.f32 1.442695, %v85_v29 }
  0x26   :  { %v120_v57 = vld [vmem:[#allocation2] sm:$0x3] }
  0x27   :  { %187 = vpow2.f32 %v88_v31 }
  0x28   :  { %189 = vpow2.f32 %v105_v34 }
  0x2b   :  { %v186_v33 = vpop.eup %185 }
  0x2c   :  { %v90_v35 = vsel %vm56_vm1, %v186_v33, 0.0 }
  0x2d   :  { %v188_v36 = vpop.eup %187  ;;  %v91_v37 = vrot.slane %v90_v35, 4 }
  0x2e   :  { %v97_v38 = vsel %vm56_vm1, %v188_v36, 0.0  ;;  %v190_v45 = vpop.eup %189 }
  0x2f   :  { %v92_v39 = vadd.f32 %v91_v37, %v90_v35  ;;  %v98_v40 = vrot.slane %v97_v38, 4  ;;  %v108_v51 = vmul.f32 %v190_v45, %v107_v48 }
  0x31   :  { %v93_v41 = vrot.slane %v92_v39, 2  ;;  %v99_v42 = vadd.f32 %v98_v40, %v97_v38 }
  0x33   :  { %v94_v43 = vadd.f32 %v93_v41, %v92_v39  ;;  %v100_v44 = vrot.slane %v99_v42, 2 }
  0x35   :  { %v95_v46 = vrot.slane %v94_v43, 1  ;;  %v101_v47 = vadd.f32 %v100_v44, %v99_v42 }
  0x37   :  { %v96_v49 = vadd.f32 %v95_v46, %v94_v43  ;;  %v102_v50 = vrot.slane %v101_v47, 1 }
  0x39   :  { %v103_v52 = vadd.f32 %v102_v50, %v101_v47 }
  0x3b   :  { %v111_v53 = vsel %vm74_vm2, %v103_v52, %v96_v49 }
  0x3c   :  { %v113_v54 = vadd.f32 %v111_v53, %v108_v51 }
  0x3e   :  { %115 = vst.msk [vmem:[#allocation3] sm:$0x3] %vm51_vm0, %v113_v54 }
  0x45   :  { %v121_v55 = vld [vmem:[#allocation3] sm:$0x3] }
  0x46   :  { %191 = vlog2.f32 %v121_v55 }
  0x4c   :  { %v192_v56 = vpop.eup %191 }
  0x4d   :  { %v123_v58 = vmul.f32 0.6931472, %v192_v56 }
  0x4f   :  { %v124_v59 = vadd.f32 %v123_v58, %v120_v57 }
  0x51   :  { %176 = vmatmul.msk.f32.vlgmr.msra.gmra.mxu0 %vm56_vm1, %v124_v59 }
  0xce   :  { %v153_v61 = vpop.f32.mrf.mxu0 }
  0xcf   :  { %v154_v62 = vadd.f32 %v184_v60, %v153_v61 }
  0xd1   :  { %193 = vtanh.f32 %v154_v62 }
  0xd7   :  { %v194_v63 = vpop.eup %193 }
  0xd8   :  { %157 = vst.msk [vmem:[#allocation9] sm:$0x3] %vm51_vm0, %v194_v63 }
  0xd9   :  { %168 = dma.vmem_to_hbm [thread:$0]  %s164_s25, 32, %s166_s28, [#allocation6]  }
  0xda   :  { %271 = dma.done.wait [#allocation6], 32  }
  0xdb   :  { %272 = vsyncadd [#allocation6], 4294967264 }
  0xdc   :  { %173 = vsyncpa [#allocation5], 1 }
  0xdd   :  { %174 = vsyncpa [#allocation8], 1 }
  0xde   :  { %175 = vsyncpa [#allocation6], 1 }

</bundles_post_ra>
